<compile_context>
chip_gen: v7x
topology: tpu7x:2x2x1
jax: 0.10.0
libtpu: 0.0.40
codegen_flags: <defaults>
</compile_context>

<pallas_src>
import functools

import numpy as np
import jax
import jax.numpy as jnp
from jax import lax
from jax.experimental import pallas as pl
from jax.experimental.pallas import tpu as pltpu


# --------------------------------- kernel ------------------------------------

def _dyn_conv_kernel(*refs, fuse_relu, has_bias, has_scale, has_shift,
                     has_residual, res_scale):
    """One grid step = (one batch sample, one lane-dense HW tile).

    Refs, in order (optional ones only present when the matching flag is set):
      w_ref:     VMEM [1, Cout, taps*Cin]  per-sample aggregated weight (compute dtype)
      bias_ref:  VMEM [1, Cout, 1]         pre-activation bias (only when fuse_relu)
      scale_ref: VMEM [1, Cout, 1]         per-channel post scale
      shift_ref: VMEM [1, Cout, 1]         per-channel post shift (bias folded in for no-ReLU)
      res_ref:   VMEM [1, Cout, tHW]       residual tile (original dtype)
      x_ref:     VMEM [1, taps*Cin, tHW]   im2col activation tile (compute dtype)
      o_ref:     VMEM [1, Cout, tHW]
    """
    it = iter(refs)
    w_ref = next(it)
    bias_ref = next(it) if has_bias else None
    scale_ref = next(it) if has_scale else None
    shift_ref = next(it) if has_shift else None
    res_ref = next(it) if has_residual else None
    x_ref = next(it)
    o_ref = next(it)

    # Single fused MXU matmul: [Cout, taps*Cin] @ [taps*Cin, tHW], f32 accumulate.
    out = jnp.dot(w_ref[0], x_ref[0], preferred_element_type=jnp.float32)

    # Whole-block epilogue, then one lane-dense full-block store.
    if has_bias:
        out = out + bias_ref[0]                    # [Cout,1] broadcast over lanes
    if fuse_relu:
        out = jnp.maximum(out, 0.0)
    if has_scale:
        out = out * scale_ref[0]
    if has_shift:
        out = out + shift_ref[0]
    if has_residual:
        out = res_ref[0].astype(jnp.float32) + res_scale * out
    o_ref[0] = out.astype(o_ref.dtype)


# ------------------------------ tiling helpers --------------------------------

def _vmem_budget_bytes():
    """~75% of this generation's VMEM (64 MiB on v7x, 128 MiB on v5e/v6e)."""
    cap = 64 * 1024 * 1024
    try:
        info = pltpu.get_tpu_info()
        cap = int(getattr(info, "vmem_capacity_bytes", cap) or cap)
    except Exception:
        pass
    return (cap * 3) // 4


def _pick_hw_tile(hw_padded, cap, bytes_per_col, budget):
    """Largest 128-multiple tile dividing hw_padded that fits the VMEM budget."""
    t = min(cap, hw_padded)
    t = max(128, (t // 128) * 128)
    while hw_padded % t != 0:
        t -= 128
    while t > 128 and bytes_per_col * t > budget:
        t -= 128
        while hw_padded % t != 0:
            t -= 128
    return t


# --------------------------------- wrapper ------------------------------------

def dynamic_conv2d(x, attention, weight, bias, *, padding=1, fuse_relu=False,
                   post_scale=None, post_shift=None, residual=None, res_scale=1.0,
                   compute_dtype=jnp.bfloat16, out_dtype=None, hw_tile_cap=None):
    """Per-sample dynamic conv (Dynamic_conv2d forward) with fused epilogue.

    Implements stride=1, dilation=1, groups=1 (the module defaults).
    Use compute_dtype=jnp.float32 for parity with a HIGHEST-precision reference.
    TODO(synk): general stride/dilation/groups would need a strided/grouped im2col.
    """
    B, Cin, H, W = x.shape
    K, Cout, Cin_w, kh, kw = weight.shape
    assert Cin_w == Cin and kh == kw
    ks = kh
    taps = ks * ks
    Hout = H + 2 * padding - ks + 1
    Wout = W + 2 * padding - ks + 1
    HW = Hout * Wout
    HWp = ((HW + 127) // 128) * 128          # lane-dense (unmasked) stores
    CKt = taps * Cin
    out_dtype = out_dtype if out_dtype is not None else x.dtype

    # --- glue: im2col -> [B, taps*Cin, HWp] in compute_dtype (bf16 halves DMA bytes)
    x_pad = jnp.pad(x.astype(compute_dtype),
                    ((0, 0), (0, 0), (padding, padding), (padding, padding)))
    patches = jnp.concatenate(
        [x_pad[:, :, dy:dy + Hout, dx:dx + Wout].reshape(B, Cin, HW)
         for dy in range(ks) for dx in range(ks)],
        axis=1)                                              # [B, taps*Cin, HW]
    if HWp != HW:
        patches = jnp.pad(patches, ((0, 0), (0, 0), (0, HWp - HW)))

    # --- per-sample expert aggregation done ONCE in the wrapper (not per HW tile)
    att_f32 = attention.astype(jnp.float32)
    w_flat = jnp.transpose(weight, (0, 1, 3, 4, 2)).reshape(K, Cout, CKt)
    w_agg = jnp.einsum('bk,koc->boc', att_f32,
                       w_flat.astype(jnp.float32)).astype(compute_dtype)
    agg_bias = (att_f32 @ bias.astype(jnp.float32)).reshape(B, Cout, 1)

    # --- epilogue operand streams (only materialized when actually needed)
    has_bias = fuse_relu                      # pre-activation bias only before ReLU
    has_scale = post_scale is not None
    scale = (post_scale.astype(jnp.float32).reshape(B, Cout, 1)
             if has_scale else None)
    if fuse_relu:
        has_shift = post_shift is not None
        shift = (post_shift.astype(jnp.float32).reshape(B, Cout, 1)
                 if has_shift else None)
    else:
        # fold conv bias into the post-shift: (acc + b) * s + t == acc*s + (b*s + t)
        has_shift = True
        shift = agg_bias
        if has_scale:
            shift = shift * scale
        if post_shift is not None:
            shift = shift + post_shift.astype(jnp.float32).reshape(B, Cout, 1)

    has_residual = residual is not None
    if has_residual:
        assert residual.shape == (B, Cout, Hout, Wout)
        res = residual.reshape(B, Cout, HW)          # keep original dtype (cast in-kernel)
        if HWp != HW:
            res = jnp.pad(res, ((0, 0), (0, 0), (0, HWp - HW)))

    # --- generation-aware HW tiling under the VMEM budget
    c_isz = jnp.dtype(compute_dtype).itemsize
    o_isz = jnp.dtype(out_dtype).itemsize
    r_isz = jnp.dtype(residual.dtype).itemsize if has_residual else 0
    per_col = 2 * (CKt * c_isz + Cout * o_isz + Cout * r_isz)      # double-buffered streams
    fixed = 2 * Cout * CKt * c_isz + 6 * Cout * 4 + (2 << 20)      # weight block + vectors + slack
    vmem_budget = _vmem_budget_bytes()
    cap = hw_tile_cap if hw_tile_cap is not None else HWp
    tHW = _pick_hw_tile(HWp, cap, per_col, max(vmem_budget - fixed, 1))

    # --- specs / args
    cvec_spec = pl.BlockSpec((1, Cout, 1), lambda b, j: (b, 0, 0))
    in_specs = [pl.BlockSpec((1, Cout, CKt), lambda b, j: (b, 0, 0))]   # w_agg (per sample)
    args = [w_agg]
    if has_bias:
        in_specs.append(cvec_spec); args.append(agg_bias)
    if has_scale:
        in_specs.append(cvec_spec); args.append(scale)
    if has_shift:
        in_specs.append(cvec_spec); args.append(shift)
    if has_residual:
        in_specs.append(pl.BlockSpec((1, Cout, tHW), lambda b, j: (b, 0, j)))
        args.append(res)
    in_specs.append(pl.BlockSpec((1, CKt, tHW), lambda b, j: (b, 0, j)))  # patches
    args.append(patches)

    kernel = functools.partial(
        _dyn_conv_kernel, fuse_relu=fuse_relu, has_bias=has_bias,
        has_scale=has_scale, has_shift=has_shift, has_residual=has_residual,
        res_scale=float(res_scale))

    out_flat = pl.pallas_call(
        kernel,
        out_shape=jax.ShapeDtypeStruct((B, Cout, HWp), out_dtype),
        grid=(B, HWp // tHW),
        in_specs=in_specs,
        out_specs=pl.BlockSpec((1, Cout, tHW), lambda b, j: (b, 0, j)),
        compiler_params=pltpu.CompilerParams(
            dimension_semantics=("parallel", "parallel"),
            vmem_limit_bytes=int(vmem_budget)),
    )(*args)

    return out_flat[:, :, :HW].reshape(B, Cout, Hout, Wout)


def residual_block_no_bn_dynamic(inputs, conv1_weight, conv1_bias,
                                 conv2_weight, conv2_bias, *,
                                 res_scale=1.0, with_bias=False, with_se=False,
                                 padding=1, compute_dtype=jnp.bfloat16,
                                 hw_tile_cap=None):
    """Forward of ResidualBlockNoBNDynamic (channel_first=False, one_layer=False).

    TODO(synk): one_layer / channel_first variants of the module are not implemented.
    """
    x = inputs['x']
    att = inputs['weights']

    # conv1 (dynamic) with fused ReLU; intermediate activation kept in bf16.
    h = dynamic_conv2d(x, att, conv1_weight, conv1_bias, padding=padding,
                       fuse_relu=True, compute_dtype=compute_dtype,
                       out_dtype=compute_dtype, hw_tile_cap=hw_tile_cap)

    # optional with_bias epilogue of the residual block, folded as scale/shift:
    #   with_se:  out = out * gamma            -> scale=gamma, shift=0
    #   else:     out = gamma * out + beta     -> scale=gamma, shift=beta
    scale = inputs['gamma'] if with_bias else None
    shift = inputs['beta'] if (with_bias and not with_se) else None

    # conv2 (dynamic) with fused scale/shift + residual add (out = x + res_scale*out).
    out = dynamic_conv2d(h, att, conv2_weight, conv2_bias, padding=padding,
                         fuse_relu=False, post_scale=scale, post_shift=shift,
                         residual=x, res_scale=res_scale,
                         compute_dtype=compute_dtype, out_dtype=x.dtype,
                         hw_tile_cap=hw_tile_cap)

    return {'x': out, 'weights': att,
            'gamma': inputs.get('gamma'), 'beta': inputs.get('beta')}


# ----------------------------- pure-JAX reference -----------------------------

def _reference_dyn_conv(x, att, weight, bias, padding):
    agg_w = jnp.einsum('bk,koihw->boihw', att, weight)       # [B,Cout,Cin,kh,kw]
    agg_b = att @ bias                                        # [B,Cout]
    outs = []
    for i in range(x.shape[0]):
        o = lax.conv_general_dilated(
            x[i:i + 1], agg_w[i], window_strides=(1, 1),
            padding=[(padding, padding), (padding, padding)],
            dimension_numbers=('NCHW', 'OIHW', 'NCHW'),
            precision=lax.Precision.HIGHEST)
        outs.append(o[0] + agg_b[i][:, None, None])
    return jnp.stack(outs, axis=0)


def reference_residual_block(inputs, w1, b1, w2, b2, *, res_scale=1.0,
                             with_bias=False, with_se=False, padding=1):
    x = inputs['x']
    att = inputs['weights']
    identity = x
    out = jax.nn.relu(_reference_dyn_conv(x, att, w1, b1, padding))
    out = _reference_dyn_conv(out, att, w2, b2, padding)
    if with_bias:
        g = inputs['gamma'][:, :, None, None]
        if with_se:
            out = out * g
        else:
            out = g * out + inputs['beta'][:, :, None, None]
    return identity + out * res_scale


if __name__ == "__main__":
    # module-consistent small shapes (defaults: k=3, stride=1, padding=1, groups=1)
    B, C, K, ksize, padding = 2, 4, 5, 3, 1

    key = jax.random.PRNGKey(0)
    keys = jax.random.split(key, 10)
    attention = jax.nn.softmax(jax.random.normal(keys[1], (B, K), jnp.float32), -1)
    # 0.1 weight scale mirrors default_init_weights(m, 0.1) in the module.
    w1 = 0.1 * jax.random.normal(keys[2], (K, C, C, ksize, ksize), jnp.float32)
    b1 = 0.1 * jax.random.normal(keys[3], (K, C), jnp.float32)
    w2 = 0.1 * jax.random.normal(keys[4], (K, C, C, ksize, ksize), jnp.float32)
    b2 = 0.1 * jax.random.normal(keys[5], (K, C), jnp.float32)
    gamma = jax.random.normal(keys[6], (B, C), jnp.float32)
    beta = jax.random.normal(keys[7], (B, C), jnp.float32)

    # case 1: 16x16 (HW=256, two 128-wide tiles), no scale/shift
    x = jax.random.normal(keys[0], (B, C, 16, 16), jnp.float32)
    inputs = {'x': x, 'weights': attention, 'gamma': gamma, 'beta': beta}
    out = residual_block_no_bn_dynamic(
        inputs, w1, b1, w2, b2, res_scale=1.0,
        with_bias=False, with_se=False, padding=padding, hw_tile_cap=128)
    out_x = jax.block_until_ready(out['x'])
    ref = jax.block_until_ready(
        reference_residual_block(inputs, w1, b1, w2, b2, res_scale=1.0,
                                 with_bias=False, with_se=False, padding=padding))
    np.testing.assert_allclose(np.asarray(out_x), np.asarray(ref),
                               rtol=2e-2, atol=5e-2)

    # case 2: 10x10 (HW=100 -> padded to 128) with with_bias (gamma/beta fold path)
    x2 = jax.random.normal(keys[8], (B, C, 10, 10), jnp.float32)
    inputs2 = {'x': x2, 'weights': attention, 'gamma': gamma, 'beta': beta}
    out2 = residual_block_no_bn_dynamic(
        inputs2, w1, b1, w2, b2, res_scale=1.0,
        with_bias=True, with_se=False, padding=padding)
    out2_x = jax.block_until_ready(out2['x'])
    ref2 = jax.block_until_ready(
        reference_residual_block(inputs2, w1, b1, w2, b2, res_scale=1.0,
                                 with_bias=True, with_se=False, padding=padding))
    np.testing.assert_allclose(np.asarray(out2_x), np.asarray(ref2),
                               rtol=2e-2, atol=5e-2)

    print("KERNEL_OK")
</pallas_src>

<mosaic_0001>
module attributes {stable_mosaic.version = 11 : i64} {
  func.func @_dyn_conv_kernel(%arg0: i32, %arg1: i32, %arg2: memref<1x4x36xbf16, #tpu.memory_space<vmem>>, %arg3: memref<1x4x1xf32, #tpu.memory_space<vmem>>, %arg4: memref<1x36x128xbf16, #tpu.memory_space<vmem>>, %arg5: memref<1x4x128xbf16, #tpu.memory_space<vmem>>) attributes {dimension_semantics = [#tpu.dimension_semantics<parallel>, #tpu.dimension_semantics<parallel>], iteration_bounds = array<i64: 2, 2>, scalar_prefetch = 0 : i64, scratch_operands = 0 : i64, tpu.core_type = #tpu.core_type<tc>, window_params = [{transform_indices = @transform_0, window_bounds = array<i64: 1, 4, 36>}, {transform_indices = @transform_1, window_bounds = array<i64: 1, 4, 1>}, {transform_indices = @transform_2, window_bounds = array<i64: 1, 36, 128>}, {transform_indices = @transform_3, window_bounds = array<i64: 1, 4, 128>}]} {
    %c0 = arith.constant 0 : index
    %c0_0 = arith.constant 0 : index
    %c0_1 = arith.constant 0 : index
    %0 = vector.load %arg2[%c0, %c0_0, %c0_1] : memref<1x4x36xbf16, #tpu.memory_space<vmem>>, vector<1x4x36xbf16>
    %1 = vector.shape_cast %0 : vector<1x4x36xbf16> to vector<4x36xbf16>
    %c0_2 = arith.constant 0 : index
    %c0_3 = arith.constant 0 : index
    %c0_4 = arith.constant 0 : index
    %2 = vector.load %arg4[%c0_2, %c0_3, %c0_4] : memref<1x36x128xbf16, #tpu.memory_space<vmem>>, vector<1x36x128xbf16>
    %3 = vector.shape_cast %2 : vector<1x36x128xbf16> to vector<36x128xbf16>
    %cst = arith.constant dense<0.000000e+00> : vector<4x128xf32>
    %4 = tpu.matmul %1, %3, %cst {dimension_numbers = #tpu.dot_dimension_numbers<[1], [0], [0], [1], [0, 0, 1, 1], [], []>} : vector<4x36xbf16>, vector<36x128xbf16>, vector<4x128xf32> -> vector<4x128xf32>
    %c0_5 = arith.constant 0 : index
    %c0_6 = arith.constant 0 : index
    %c0_7 = arith.constant 0 : index
    %5 = vector.load %arg3[%c0_5, %c0_6, %c0_7] : memref<1x4x1xf32, #tpu.memory_space<vmem>>, vector<1x4x1xf32>
    %6 = vector.shape_cast %5 : vector<1x4x1xf32> to vector<4x1xf32>
    %7 = vector.broadcast %6 : vector<4x1xf32> to vector<4x128xf32>
    %8 = arith.addf %4, %7 : vector<4x128xf32>
    %cst_8 = arith.constant 0.000000e+00 : f32
    %9 = vector.broadcast %cst_8 : f32 to vector<4x128xf32>
    %10 = arith.maximumf %8, %9 : vector<4x128xf32>
    %11 = arith.truncf %10 : vector<4x128xf32> to vector<4x128xbf16>
    %c0_9 = arith.constant 0 : index
    %c0_10 = arith.constant 0 : index
    %c0_11 = arith.constant 0 : index
    %12 = vector.load %arg5[%c0_9, %c0_10, %c0_11] : memref<1x4x128xbf16, #tpu.memory_space<vmem>>, vector<1x4x128xbf16>
    %13 = vector.shape_cast %12 : vector<1x4x128xbf16> to vector<4x128xbf16>
    %14 = vector.shape_cast %11 : vector<4x128xbf16> to vector<1x4x128xbf16>
    tpu.vector_store %arg5[%c0_9, %c0_10, %c0_11], %14 {strides = array<i32>} : memref<1x4x128xbf16, #tpu.memory_space<vmem>>, vector<1x4x128xbf16>,
    return
  }
  func.func @transform_0(%arg0: i32, %arg1: i32) -> (i32, i32, i32) {
    %c0_i32 = arith.constant 0 : i32
    %c0_i32_0 = arith.constant 0 : i32
    %c0_i32_1 = arith.constant 0 : i32
    return %arg0, %c0_i32, %c0_i32_0 : i32, i32, i32
  }
  func.func @transform_1(%arg0: i32, %arg1: i32) -> (i32, i32, i32) {
    %c0_i32 = arith.constant 0 : i32
    %c0_i32_0 = arith.constant 0 : i32
    %c0_i32_1 = arith.constant 0 : i32
    return %arg0, %c0_i32, %c0_i32_0 : i32, i32, i32
  }
  func.func @transform_2(%arg0: i32, %arg1: i32) -> (i32, i32, i32) {
    %c0_i32 = arith.constant 0 : i32
    %c0_i32_0 = arith.constant 0 : i32
    return %arg0, %c0_i32, %arg1 : i32, i32, i32
  }
  func.func @transform_3(%arg0: i32, %arg1: i32) -> (i32, i32, i32) {
    %c0_i32 = arith.constant 0 : i32
    %c0_i32_0 = arith.constant 0 : i32
    return %arg0, %c0_i32, %arg1 : i32, i32, i32
  }
}

</mosaic_0001>

<bundles_post_ra>
// kernel: tpu_custom_call.1
= control target key start
LH: loop header
LB: loop body
LE: loop exit
PB: predicated region body
PF: predicated region fallthrough
CT: control target
= control target key end

     0   :  { %8 = vsyncpa [#allocation4], 0  ;;  %s867_s0 = inlined_call_operand.vmem [shape: bf16[2,4,36], index: 0, kind: input, shape index: {}]   ;;  %s868_s1 = inlined_call_operand.vmem [shape: f32[2,4,1], index: 1, kind: input, shape index: {}]   ;;  %s869_s2 = inlined_call_operand.vmem [shape: bf16[2,36,256], index: 2, kind: input, shape index: {}]   ;;  %s870_s3 = inlined_call_operand.hbm [shape: bf16[2,4,256], index: 3, kind: output, shape index: {}]  }
   0x1   :  { %10 = vsyncpa [#allocation4 + $0x1], 0  ;;  %s710_s12 = smov 0   ;;  %s712_s13 = smov 0  }
   0x2   :  { %s714_s14 = smov 0   ;;  %s716_s15 = smov 0  }
   0x3   :  { %s718_s16 = smov 0   ;;  %s720_s17 = smov 0  }
   0x4   :  { %s722_s18 = smov 0   ;;  %s724_s19 = smov 0  }
   0x5 LB: > { %s477_s20 = sadd.s32 4294967295, %s684_s19   ;;  %s478_s21 = sadd.s32 4294967294, %s684_s19   ;;  %s684_s19 = sphi %s724_s19, %s16_s19   ;;  %s680_s18 = sphi %s722_s18, %s880_s18   ;;  %s676_s17 = sphi %s720_s17, %s879_s17   ;;  %s672_s16 = sphi %s718_s16, %s878_s16   ;;  %s668_s15 = sphi %s716_s15, %s877_s15   ;;  %s664_s14 = sphi %s714_s14, %s876_s14   ;;  %s660_s13 = sphi %s712_s13, %s875_s13   ;;  %s656_s12 = sphi %s710_s12, %s874_s12  }
   0x6   : > { %s25_s22 = sadd.s32 1, %s676_s17  ;;  %s28_s23 = sadd.s32 1, %s680_s18 }
   0x7   : > { %p26_p0 = scmp.ge.s32.totalorder %s25_s22, 2  ;;  %p96_p1 = scmp.ne.s32.totalorder %s664_s14, %s660_s13 }
   0x8   : > { %p97_p2 = scmp.eq.s32.totalorder %s684_s19, 0  ;;  %p128_p5 = scmp.eq.s32.totalorder %s477_s20, 3 }
   0x9   : > { %s882_s22 = smov (%p26_p0, %s25_s22), 0  ;;  %s884_s23 = smov (!%p26_p0, %s28_s23), %s680_s18 }
   0xa   : > { %s85_s24 = ssub.s32 %s676_s17, %s882_s22  ;;  %p762_p3 = por %p97_p2, %p96_p1 }
   0xb   : > { %p30_p4 = scmp.ge.s32.totalorder %s884_s23, 2  ;;  %p133_p6 = scmp.ne.s32.totalorder %s660_s13, %s656_s12 }
   0xc   : > { %p134_p7 = scmp.eq.s32.totalorder %s478_s21, 3  ;;  %p770_p8 = por %p128_p5, %p96_p1 }
   0xd   : > { %s886_s23 = smov (%p30_p4, %s884_s23), 0  ;;  %s89_s30 = sadd.s32 1, %s664_s14 }
   0xe   : > { %p774_p9 = por %p134_p7, %p133_p6  ;;  %s84_s28 = ssub.s32 %s680_s18, %s886_s23 }
   0xf   : > { %s86_s29 = sor.u32 %s85_s24, %s84_s28  ;;  %p480_p11 = scmp.ge.s32.totalorder %s684_s19, 4 }
  0x10   : > { %p87_p10 = scmp.eq.s32.totalorder %s86_s29, 0 }
  0x11   : > { %150 = sbr.rel (%p480_p11) target bundleno = 34 (0x22), region = 16 }
  0x12   : > { %s782_s4 = scalar_select %p87_p10, %s664_s14, %s89_s30  }
  0x18   : > { %167 = sbr.rel (!%p762_p3) target bundleno = 34 (0x22), region = 28  ;;  %s169_s5 = sand.u32 (%p762_p3), 1, %s664_s14  }
  0x19   : > { %s510_s6 = smul.u32 (%p762_p3), 10, %s680_s18 }
  0x1a   : > { %s509_s7 = smul.u32 (%p762_p3), 20, %s169_s5 }
  0x1b   : > { %s173_s8 = sadd.s32 (%p762_p3), %s676_s17, %s510_s6 }
  0x1c   : > { %s481_s9 = sshll.u32 (%p762_p3), %s173_s8, 2  ;;  %s171_s21 = scalar_lea.vmem (%p762_p3), [#allocation2], %s509_s7 }
  0x1d   : > { %s175_s20 = scalar_lea.vmem (%p762_p3), %s869_s2, %s481_s9 }
  0x1e   : > { %v191_v0 = vld [vmem:[%s175_s20] sm:$0xf] (%p762_p3)  ;;  %v193_v1 = vld [vmem:[%s175_s20 + $0x8] sm:$0xf] (%p762_p3)  ;;  %v195_v2 = vld [vmem:[%s175_s20 + $0x10] sm:$0xf] (%p762_p3) }
  0x1f   : > { %192 = vst [vmem:[%s171_s21] sm:$0xf] %v191_v0  ;;  %194 = vst [vmem:[%s171_s21 + $0x4] sm:$0xf] %v193_v1  ;;  %v197_v3 = vld [vmem:[%s175_s20 + $0x18] sm:$0xf] }
  0x20   : > { %196 = vst [vmem:[%s171_s21 + $0x8] sm:$0xf] %v195_v2  ;;  %v199_v4 = vld [vmem:[%s175_s20 + $0x20] sm:$0xf]  ;;  %198 = vst [vmem:[%s171_s21 + $0xc] sm:$0xf] %v197_v3 }
  0x21   : > { %200 = vst [vmem:[%s171_s21 + $0x10] sm:$0xf] %v199_v4 }
  0x22 PF: > { %p482_p12 = scmp.ge.s32.totalorder %s684_s19, 1  ;;  %p232_p13 = scmp.lt.s32.totalorder %s684_s19, 5 }
  0x24   : > { %p233_p0 = pnand %p482_p12, %p232_p13 }
  0x25   : > { %s796_s24 = sand.u32 (!%p233_p0), 1, %s660_s13   ;;  %p270_p1 = scmp.lt.s32.totalorder (!%p233_p0), %s672_s16, 1  ;;  %v686_v5 = vmov (!%p233_p0), 0.0   ;;  %vm687_vm0 = vmmov (!%p233_p0), 0   ;;  %v688_v6 = vmov (!%p233_p0), 0   ;;  %vm310_vm1 = vcmask (!%p233_p0), 1041408  }
  0x26   : > { %236 = sbr.rel (%p233_p0) target bundleno = 286 (0x11e), region = 69  ;;  %499 = vmatprep.subr.bf16.mxu0 (!%p233_p0), %v686_v5  ;;  %505 = vmatprep.mubr.msk.bf16.mxu0 (!%p233_p0), %vm687_vm0, %v686_v5  ;;  %vm306_vm2 = vcmask (!%p233_p0), 293888   ;;  %s483_s20 = sshll.u32 (!%p233_p0), %s796_s24, 1 }
  0x27   : > { %s511_s25 = smul.u32 (!%p233_p0), 20, %s796_s24  ;;  %586 = vset.pattern.permute.xlu0 (!%p233_p0), %v688_v6  ;;  %s491_s21 = sshll.u32 (!%p233_p0), %s672_s16, 1 }
  0x29   : > { %s241_s29 = scalar_lea.vmem (!%p233_p0), [#allocation2], %s511_s25  ;;  %s369_s25 = sadd.s32 (!%p233_p0), %s668_s15, %s491_s21 }
  0x2a   : > { %v587_v7 = vld [vmem:[%s241_s29] sm:$0xff] (!%p233_p0)   ;;  %v588_v8 = vld [vmem:[%s241_s29 + $0x8] sm:$0xff] (!%p233_p0)   ;;  %v589_v9 = vld [vmem:[%s241_s29 + $0x10] ss:$0 sps:$4 sm:$0x33] (!%p233_p0)   ;;  %s269_s29 = scalar_lea.vmem (!%p233_p0), [#allocation3], %s483_s20 }
  0x2b   : > { %500 = vmatpush3.bf16.msra.mxu0 (!%p233_p0), %v587_v7  ;;  %v312_v11 = vsel (!%p233_p0), %vm310_vm1, %v589_v9, 0  ;;  %s358_s15 = scalar_lea.sflag (!%p233_p0), [#allocation4], %s796_s24 }
  0x2c   : > { %501 = vmatprep.subr.bf16.mxu0 (!%p233_p0), %v686_v5 }
  0x2d   : > { %s271_s28 = scalar_select %p270_p1, %s672_s16, 1 }
  0x2f   : > { %s485_s30 = sshll.u32 %s271_s28, 2  ;;  %s484_s8 = sshll.u32 %s271_s28, 1  ;;  %502 = vmatpush3.bf16.msra.mxu0 %v588_v8 }
  0x30   : > { %s277_s7 = scalar_lea.vmem %s868_s1, %s485_s30  ;;  %503 = vmatprep.subr.bf16.mxu0 %v686_v5  ;;  %s273_s11 = scalar_lea.vmem %s867_s0, %s484_s8 }
  0x31   : > { %v285_v10 = vld [vmem:[%s277_s7] sm:$0xf]  ;;  %s492_s28 = sshll.u32 %s369_s25, 5  ;;  %s373_s30 = sshll.u32 %s269_s29, 4  ;;  %s815_s30 = int_to_ptr.vmem [resolvable:$true] %s373_s30 }
  0x32   : > { %288 = vperm.xlu0 %586, %v285_v10   ;;  %v279_v12 = vld [vmem:[%s273_s11] sm:$0x3]  ;;  %s813_s7 = scalar_lea.hbm %s870_s3, %s492_s28  ;;  %s590_s16 = scalar_lea.vmem %s815_s30, 32 }
  0x33   : > { %504 = vmatpush3.bf16.msra.mxu0 %v312_v11  ;;  %p591_p2 = scmp.ne.s32.totalorder %s815_s30, %s590_s16  ;;  %s689_s8 = smov [#allocation3]  }
  0x34   : > { %s594_s9 = sshll.u32 %s689_s8, 4  ;;  %s595_s9 = int_to_ptr.vmem [resolvable:$false] %s594_s9 }
  0x35   : > { %p592_p3 = pnand %p591_p2, %p770_p8  ;;  %s596_s10 = scalar_lea.vmem %s595_s9, 64 }
  0x36   : > { %506 = vmatmul.mubr.msk.bf16.vlgmr.msra.gmra.mrb[0].mxu0 %vm306_vm2, %v279_v12  ;;  %p597_p5 = scmp.lt.s32.totalorder %s815_s30, %s595_s9  ;;  %p598_p6 = scmp.lt.s32.totalorder %s596_s10, %s590_s16 }
  0x37   : > { %p593_p4 = pneg %p592_p3 }
  0x38   : > { %p599_p7 = por %p598_p6, %p597_p5 }
  0x3a   : > { %p600_p10 = pnand %p599_p7, %p593_p4 }
  0xb1   : > { %v289_v13 = vpop.permute.xlu0 %288 }
 0x109   : > { %v348_v14 = vpop.f32.mrb[0].mxu0 }
 0x10a   : > { %v349_v15 = vadd.f32 %v348_v14, %v289_v13  ;;  %v507_v16 = vpop.f32.mrb[1].mxu0 }
 0x10b   : > { %v351_v17 = vpop.f32.mrb[2].mxu0 }
 0x10c   : > { %v354_v18 = vmax.f32 %v349_v15, 0.0  ;;  %v508_v19 = vpop.f32.mrb[3].mxu0 }
 0x10e   : > { %v355_v20 = vpack.c.bf16 %v354_v18, %v354_v18 }
 0x110   : > { %356 = vst [vmem:[%s269_s29] sm:$0x3] %v355_v20 }
 0x111   : > { %603 = shalt.err (!%p600_p10)
}
 0x112   : > { %s604_s24 = scalar_lea.hbm %s813_s7, 32  ;;  %s608_s21 = scalar_lea.hbm %s870_s3, 128 }
 0x113   : > { %p605_p11 = scmp.ne.s32.totalorder %s813_s7, %s604_s24  ;;  %p609_p0 = scmp.lt.u32.totalorder %s813_s7, %s870_s3 }
 0x114   : > { %p610_p1 = scmp.lt.u32.totalorder %s608_s21, %s604_s24  ;;  %p612_p3 = scmp.lt.u32.totalorder %s604_s24, %s813_s7 }
 0x115   : > { %p606_p12 = pnand %p605_p11, %p770_p8 }
 0x116   : > { %p611_p2 = por %p610_p1, %p609_p0 }
 0x117   : > { %p607_p13 = pneg %p606_p12 }
 0x118   : > { %p613_p4 = por %p612_p3, %p611_p2 }
 0x11a   : > { %p614_p5 = pnand %p613_p4, %p607_p13 }
 0x11c   : > { %617 = shalt.err (!%p614_p5)
}
 0x11d   : > { %512 = dma.vmem_to_hbm [thread:$0]  (%p770_p8), %s815_s30, 32, %s813_s7, %s358_s15  }
 0x11e PF: > { %p518_p6 = scmp.ge.s32.totalorder %s684_s19, 2  ;;  %s385_s29 = sand.u32 1, %s656_s12  }
 0x11f   : > { %s386_s5 = scalar_lea.sflag [#allocation4], %s385_s29 }
 0x120   : > { %p515_p7 = pnand %p518_p6, %p774_p9 }
 0x122   : > { %651 = dma.done.wait (!%p515_p7), %s386_s5, 32  }
 0x123   : > { %653 = vsyncadd (!%p515_p7), %s386_s5, 4294967264  ;;  %s16_s19 = sadd.s32 1, %s684_s19   ;;  %s874_s12 = smov %s660_s13 }
 0x124   : > { %p13_p10 = scmp.ge.s32.totalorder %s16_s19, 6   ;;  %s875_s13 = smov %s664_s14 }
 0x125   : > { %s876_s14 = smov %s782_s4  ;;  %s877_s15 = smov %s676_s17 }
 0x126   : > { %s878_s16 = smov %s680_s18  ;;  %s879_s17 = smov %s882_s22 }
 0x127   : > { %s880_s18 = smov %s886_s23  ;;  %15 = sbr.rel (!%p13_p10) target bundleno = 5 (0x5), region = 119 }
 0x12e   :  { %391 = vsyncpa [#allocation4], 1 }
 0x12f   :  { %393 = vsyncpa [#allocation4 + $0x1], 1 }

</bundles_post_ra>
